<compile_context>
chip_gen: v6e
topology: v6e:2x2x1
jax: 0.10.0
libtpu: 0.0.40
codegen_flags: <defaults>
</compile_context>

<pallas_src>
from functools import partial

import jax
import jax.numpy as jnp
from jax import lax
from jax.experimental import pallas as pl
from jax.experimental.pallas import tpu as pltpu

_NEG_INF = -1e30                   # large finite negative: no NaNs even for fully-masked rows
_VMEM_LIMIT = 64 * 1024 * 1024     # TODO(synk): halve tile targets / limit when targeting v7x (64 MiB VMEM).


def _pick_tile(dim, target):
    """Use `target` (a multiple of the (8,128) alignment) if it divides `dim`
    exactly, otherwise fall back to the full dimension (always legal)."""
    return target if dim % target == 0 else dim


# ---------------------------------------------------------------------------
# Tiled linear kernel:  out = x @ w + b   (f32 accumulator in VMEM scratch)
# ---------------------------------------------------------------------------
def _linear_kernel(x_ref, w_ref, b_ref, o_ref, acc_ref):
    k = pl.program_id(2)

    @pl.when(k == 0)
    def _():
        acc_ref[...] = jnp.zeros_like(acc_ref)

    acc_ref[...] += jnp.dot(x_ref[...], w_ref[...],
                            preferred_element_type=jnp.float32)

    @pl.when(k == pl.num_programs(2) - 1)
    def _():
        o_ref[...] = (acc_ref[...] + b_ref[...].astype(jnp.float32)).astype(o_ref.dtype)


def _linear(x, w, b, *, tm=256, tn=512, tk=512):
    M, K = x.shape
    Kw, N = w.shape
    assert K == Kw and b.shape == (1, N)
    tm, tn, tk = _pick_tile(M, tm), _pick_tile(N, tn), _pick_tile(K, tk)
    itemsize = jnp.dtype(x.dtype).itemsize
    return pl.pallas_call(
        _linear_kernel,
        out_shape=jax.ShapeDtypeStruct((M, N), x.dtype),
        grid_spec=pltpu.PrefetchScalarGridSpec(
            num_scalar_prefetch=0,
            grid=(M // tm, N // tn, K // tk),
            in_specs=[
                pl.BlockSpec((tm, tk), lambda i, j, k: (i, k)),   # x tile
                pl.BlockSpec((tk, tn), lambda i, j, k: (k, j)),   # w tile
                pl.BlockSpec((1, tn), lambda i, j, k: (0, j)),    # bias tile
            ],
            out_specs=pl.BlockSpec((tm, tn), lambda i, j, k: (i, j)),
            scratch_shapes=[pltpu.VMEM((tm, tn), jnp.float32)],
        ),
        compiler_params=pltpu.CompilerParams(
            dimension_semantics=("parallel", "parallel", "arbitrary"),
            vmem_limit_bytes=_VMEM_LIMIT,
        ),
        cost_estimate=pl.CostEstimate(
            flops=2 * M * N * K,
            bytes_accessed=(M * K + K * N + N + M * N) * itemsize,
            transcendentals=0,
        ),
    )(x, w, b)


# ---------------------------------------------------------------------------
# Flash attention kernel: heads folded into the batch axis, online softmax,
# causal tile skipping, deferred normalization.
# ---------------------------------------------------------------------------
def _flash_kernel(q_ref, k_ref, v_ref, o_ref, m_scr, l_scr, acc_scr,
                  *, tq, tk, scale, approx_recip):
    qi = pl.program_id(1)
    ki = pl.program_id(2)

    @pl.when(ki == 0)
    def _():
        m_scr[...] = jnp.full_like(m_scr, _NEG_INF)
        l_scr[...] = jnp.zeros_like(l_scr)
        acc_scr[...] = jnp.zeros_like(acc_scr)

    q_start = qi * tq
    k_start = ki * tk

    # Causal tile skipping: a KV tile contributes only if its first key
    # position is <= the last query position of this Q tile.
    @pl.when(k_start < q_start + tq)
    def _():
        q = q_ref[0]                                       # (tq, H)
        k = k_ref[0]                                       # (tk, H)
        v = v_ref[0]                                       # (tk, H)

        # S = q @ k^T without materializing k^T (contract last dims on MXU).
        s = lax.dot_general(q, k, (((1,), (1,)), ((), ())),
                            preferred_element_type=jnp.float32) * scale

        def accumulate(s):
            m_prev = m_scr[...]                                        # (tq, 1)
            m_new = jnp.maximum(m_prev, jnp.max(s, axis=-1, keepdims=True))
            alpha = jnp.exp(m_prev - m_new)                            # (tq, 1)
            p = jnp.exp(s - m_new)                                     # (tq, tk), unnormalized
            l_scr[...] = alpha * l_scr[...] + jnp.sum(p, axis=-1, keepdims=True)
            acc_scr[...] = alpha * acc_scr[...] + jnp.dot(
                p.astype(v.dtype), v, preferred_element_type=jnp.float32)
            m_scr[...] = m_new

        # The iota causal mask is only needed on diagonal-straddling tiles.
        on_diag = (k_start + tk - 1) > q_start

        @pl.when(on_diag)
        def _():
            row = lax.broadcasted_iota(jnp.int32, (tq, tk), 0) + q_start
            col = lax.broadcasted_iota(jnp.int32, (tq, tk), 1) + k_start
            accumulate(jnp.where(row >= col, s, _NEG_INF))

        @pl.when(jnp.logical_not(on_diag))
        def _():
            accumulate(s)

    # Deferred softmax normalization: one (tq, 1) reciprocal (EUP) and a
    # (tq, H) multiply instead of dividing the full (tq, tk) matrix.
    @pl.when(ki == pl.num_programs(2) - 1)
    def _():
        inv_l = pl.reciprocal(l_scr[...], approx=approx_recip)
        o_ref[0] = (acc_scr[...] * inv_l).astype(o_ref.dtype)
    # TODO(synk): attention-weight dropout omitted (eval mode / p=0).


def _flash_attention(q, k, v, *, tq=256, tk=512):
    BH, T, H = q.shape
    tq, tk = _pick_tile(T, tq), _pick_tile(T, tk)
    scale = 1.0 / (H ** 0.5)
    approx_recip = jnp.dtype(q.dtype) != jnp.dtype(jnp.float32)   # exact divide for f32 runs
    itemsize = jnp.dtype(q.dtype).itemsize
    kernel = partial(_flash_kernel, tq=tq, tk=tk, scale=scale,
                     approx_recip=approx_recip)
    return pl.pallas_call(
        kernel,
        out_shape=jax.ShapeDtypeStruct((BH, T, H), q.dtype),
        grid_spec=pltpu.PrefetchScalarGridSpec(
            num_scalar_prefetch=0,
            grid=(BH, T // tq, T // tk),
            in_specs=[
                pl.BlockSpec((1, tq, H), lambda b, i, j: (b, i, 0)),   # Q tile
                pl.BlockSpec((1, tk, H), lambda b, i, j: (b, j, 0)),   # K tile
                pl.BlockSpec((1, tk, H), lambda b, i, j: (b, j, 0)),   # V tile
            ],
            out_specs=pl.BlockSpec((1, tq, H), lambda b, i, j: (b, i, 0)),
            scratch_shapes=[
                pltpu.VMEM((tq, 1), jnp.float32),   # running max  m
                pltpu.VMEM((tq, 1), jnp.float32),   # running sum  l
                pltpu.VMEM((tq, H), jnp.float32),   # output accumulator
            ],
        ),
        compiler_params=pltpu.CompilerParams(
            # batch*heads and query tiles are independent -> megacore-parallel
            # (helps v7x's 2 TensorCores); KV tiles carry the accumulator.
            dimension_semantics=("parallel", "parallel", "arbitrary"),
            vmem_limit_bytes=_VMEM_LIMIT,
        ),
        cost_estimate=pl.CostEstimate(
            flops=2 * 2 * BH * T * T * H,            # S = QK^T and P @ V
            bytes_accessed=4 * BH * T * H * itemsize,
            transcendentals=BH * T * T,              # softmax exp
        ),
    )(q, k, v)


# ---------------------------------------------------------------------------
# Module forward
# ---------------------------------------------------------------------------
def multi_head_self_attention(x, wq, wk, wv, wo, bo, *, n_heads,
                              tq=256, tk=512):
    B, T, E = x.shape
    H = E // n_heads
    assert H * n_heads == E

    # 1) Fused QKV projection: one (B*T, E) @ (E, 3E) tiled matmul (bias-free,
    #    as in the per-head nn.Linear(..., bias=False)).
    wqkv = jnp.concatenate([wq, wk, wv], axis=1)                  # (E, 3E)
    zero_bias = jnp.zeros((1, 3 * E), dtype=x.dtype)
    qkv = _linear(x.reshape(B * T, E), wqkv, zero_bias)           # (B*T, 3E)

    # 2) Split heads once (wrapper-side layout plumbing, outside the hot loop).
    qkv = qkv.reshape(B, T, 3, n_heads, H).transpose(2, 0, 3, 1, 4)
    q = qkv[0].reshape(B * n_heads, T, H)
    k = qkv[1].reshape(B * n_heads, T, H)
    v = qkv[2].reshape(B * n_heads, T, H)

    # 3) Flash attention with online softmax + causal tile skipping.
    att = _flash_attention(q, k, v, tq=tq, tk=tk)                 # (B*nH, T, H)

    # 4) Concatenate heads (pure reshape/transpose) + output projection.
    att = att.reshape(B, n_heads, T, H).transpose(0, 2, 1, 3).reshape(B * T, E)
    y = _linear(att, wo, bo)
    # TODO(synk): output dropout omitted (eval mode / p=0).
    return y.reshape(B, T, E)


def reference_mhsa(x, wq, wk, wv, wo, bo, *, n_heads):
    """Pure-JAX reference mirroring the PyTorch module semantics."""
    B, T, E = x.shape
    H = E // n_heads
    q = x @ wq
    k = x @ wk
    v = x @ wv
    outs = []
    mask = jnp.tril(jnp.ones((T, T), dtype=bool))
    for h in range(n_heads):
        sl = slice(h * H, (h + 1) * H)
        qh, kh, vh = q[..., sl], k[..., sl], v[..., sl]
        s = jnp.einsum("btd,bsd->bts", qh, kh) * (H ** -0.5)
        s = jnp.where(mask, s, -jnp.inf)
        p = jax.nn.softmax(s, axis=-1)
        outs.append(jnp.einsum("bts,bsd->btd", p, vh))
    att = jnp.concatenate(outs, axis=-1)
    return att @ wo + bo


if __name__ == "__main__":
    # Small deterministic config: n_heads=4, block_size=T=8, emb_dim=32, dropout=0.
    B, T, E, n_heads = 2, 8, 32, 4

    key = jax.random.PRNGKey(0)
    kx, kq, kk, kv, ko, kb = jax.random.split(key, 6)

    x = jax.random.normal(kx, (B, T, E), dtype=jnp.float32)
    scale = 1.0 / jnp.sqrt(jnp.float32(E))
    wq = jax.random.normal(kq, (E, E), dtype=jnp.float32) * scale
    wk = jax.random.normal(kk, (E, E), dtype=jnp.float32) * scale
    wv = jax.random.normal(kv, (E, E), dtype=jnp.float32) * scale
    wo = jax.random.normal(ko, (E, E), dtype=jnp.float32) * scale
    bo = jax.random.normal(kb, (1, E), dtype=jnp.float32) * 0.01

    ref = reference_mhsa(x, wq, wk, wv, wo, bo, n_heads=n_heads)

    # f32 path (tight correctness check).
    out = multi_head_self_attention(x, wq, wk, wv, wo, bo, n_heads=n_heads)
    out = jax.block_until_ready(out)
    assert out.shape == (B, T, E)
    assert jnp.allclose(out, ref, atol=1e-4, rtol=1e-4), "f32 mismatch vs reference"

    # bf16 path (what production would run on the bf16 MXUs of v5e/v6e/v7x).
    bf = lambda a: a.astype(jnp.bfloat16)
    out_bf16 = multi_head_self_attention(bf(x), bf(wq), bf(wk), bf(wv), bf(wo),
                                         bf(bo), n_heads=n_heads)
    out_bf16 = jax.block_until_ready(out_bf16)
    assert jnp.allclose(out_bf16.astype(jnp.float32), ref, atol=1e-1, rtol=1e-1), \
        "bf16 mismatch vs reference"

    print("KERNEL_OK")
</pallas_src>

<mosaic_0001>
module attributes {stable_mosaic.version = 11 : i64} {
  func.func @_linear_kernel(%arg0: i32, %arg1: i32, %arg2: i32, %arg3: memref<16x32xf32, #tpu.memory_space<vmem>>, %arg4: memref<32x96xf32, #tpu.memory_space<vmem>>, %arg5: memref<1x96xf32, #tpu.memory_space<vmem>>, %arg6: memref<16x96xf32, #tpu.memory_space<vmem>>, %arg7: memref<16x96xf32, #tpu.memory_space<vmem>>) attributes {dimension_semantics = [#tpu.dimension_semantics<parallel>, #tpu.dimension_semantics<parallel>, #tpu.dimension_semantics<arbitrary>], iteration_bounds = array<i64: 1, 1, 1>, scalar_prefetch = 0 : i64, scratch_operands = 1 : i64, tpu.core_type = #tpu.core_type<tc>, window_params = [{transform_indices = @transform_0, window_bounds = array<i64: 16, 32>}, {transform_indices = @transform_1, window_bounds = array<i64: 32, 96>}, {transform_indices = @transform_2, window_bounds = array<i64: 1, 96>}, {transform_indices = @transform_3, window_bounds = array<i64: 16, 96>}]} {
    %c0_i32 = arith.constant 0 : i32
    %0 = arith.cmpi eq, %arg2, %c0_i32 : i32
    %1 = arith.extui %0 : i1 to i32
    %c0_i32_0 = arith.constant 0 : i32
    %2 = arith.cmpi ne, %1, %c0_i32_0 : i32
    scf.if %2 {
      %cst_10 = arith.constant 0.000000e+00 : f32
      %12 = vector.broadcast %cst_10 : f32 to vector<16x96xf32>
      %c0_11 = arith.constant 0 : index
      %c0_12 = arith.constant 0 : index
      %13 = vector.load %arg7[%c0_11, %c0_12] : memref<16x96xf32, #tpu.memory_space<vmem>>, vector<16x96xf32>
      tpu.vector_store %arg7[%c0_11, %c0_12], %12 {strides = array<i32>} : memref<16x96xf32, #tpu.memory_space<vmem>>, vector<16x96xf32>,
    } else {
    }
    %c0 = arith.constant 0 : index
    %c0_1 = arith.constant 0 : index
    %3 = vector.load %arg7[%c0, %c0_1] : memref<16x96xf32, #tpu.memory_space<vmem>>, vector<16x96xf32>
    %c0_2 = arith.constant 0 : index
    %c0_3 = arith.constant 0 : index
    %4 = vector.load %arg3[%c0_2, %c0_3] : memref<16x32xf32, #tpu.memory_space<vmem>>, vector<16x32xf32>
    %c0_4 = arith.constant 0 : index
    %c0_5 = arith.constant 0 : index
    %5 = vector.load %arg4[%c0_4, %c0_5] : memref<32x96xf32, #tpu.memory_space<vmem>>, vector<32x96xf32>
    %cst = arith.constant dense<0.000000e+00> : vector<16x96xf32>
    %6 = tpu.matmul %4, %5, %cst {dimension_numbers = #tpu.dot_dimension_numbers<[1], [0], [0], [1], [0, 0, 1, 1], [], []>} : vector<16x32xf32>, vector<32x96xf32>, vector<16x96xf32> -> vector<16x96xf32>
    %7 = arith.addf %3, %6 : vector<16x96xf32>
    %c0_6 = arith.constant 0 : index
    %c0_7 = arith.constant 0 : index
    %8 = vector.load %arg7[%c0_6, %c0_7] : memref<16x96xf32, #tpu.memory_space<vmem>>, vector<16x96xf32>
    tpu.vector_store %arg7[%c0_6, %c0_7], %7 {strides = array<i32>} : memref<16x96xf32, #tpu.memory_space<vmem>>, vector<16x96xf32>,
    %c0_i32_8 = arith.constant 0 : i32
    %9 = arith.cmpi eq, %arg2, %c0_i32_8 : i32
    %10 = arith.extui %9 : i1 to i32
    %c0_i32_9 = arith.constant 0 : i32
    %11 = arith.cmpi ne, %10, %c0_i32_9 : i32
    scf.if %11 {
      %c0_10 = arith.constant 0 : index
      %c0_11 = arith.constant 0 : index
      %12 = vector.load %arg7[%c0_10, %c0_11] : memref<16x96xf32, #tpu.memory_space<vmem>>, vector<16x96xf32>
      %c0_12 = arith.constant 0 : index
      %c0_13 = arith.constant 0 : index
      %13 = vector.load %arg5[%c0_12, %c0_13] : memref<1x96xf32, #tpu.memory_space<vmem>>, vector<1x96xf32>
      %14 = vector.broadcast %13 : vector<1x96xf32> to vector<16x96xf32>
      %15 = arith.addf %12, %14 : vector<16x96xf32>
      %c0_14 = arith.constant 0 : index
      %c0_15 = arith.constant 0 : index
      %16 = vector.load %arg6[%c0_14, %c0_15] : memref<16x96xf32, #tpu.memory_space<vmem>>, vector<16x96xf32>
      tpu.vector_store %arg6[%c0_14, %c0_15], %15 {strides = array<i32>} : memref<16x96xf32, #tpu.memory_space<vmem>>, vector<16x96xf32>,
    } else {
    }
    return
  }
  func.func @transform_0(%arg0: i32, %arg1: i32, %arg2: i32) -> (i32, i32) {
    %c0_i32 = arith.constant 0 : i32
    return %arg0, %arg2 : i32, i32
  }
  func.func @transform_1(%arg0: i32, %arg1: i32, %arg2: i32) -> (i32, i32) {
    %c0_i32 = arith.constant 0 : i32
    return %arg2, %arg1 : i32, i32
  }
  func.func @transform_2(%arg0: i32, %arg1: i32, %arg2: i32) -> (i32, i32) {
    %c0_i32 = arith.constant 0 : i32
    %c0_i32_0 = arith.constant 0 : i32
    return %c0_i32, %arg1 : i32, i32
  }
  func.func @transform_3(%arg0: i32, %arg1: i32, %arg2: i32) -> (i32, i32) {
    %c0_i32 = arith.constant 0 : i32
    return %arg0, %arg1 : i32, i32
  }
}

</mosaic_0001>

<bundles_post_ra>
// kernel: tpu_custom_call.1
= control target key start
LH: loop header
LB: loop body
LE: loop exit
PB: predicated region body
PF: predicated region fallthrough
CT: control target
= control target key end

     0   :  { %8 = vsyncpa [#allocation4], 0  ;;  %s326_s0 = inlined_call_operand.hbm [shape: f32[16,32], index: 0, kind: input, shape index: {}]   ;;  %s327_s1 = inlined_call_operand.hbm [shape: f32[32,96], index: 1, kind: input, shape index: {}]   ;;  %s328_s2 = inlined_call_operand.vmem [shape: f32[1,96], index: 2, kind: input, shape index: {}]   ;;  %s329_s3 = inlined_call_operand.hbm [shape: f32[16,96], index: 3, kind: output, shape index: {}]  }
   0x1   :  { %9 = vsyncpa [#allocation7], 0 }
   0x2   :  { %10 = vsyncpa [#allocation5], 0  ;;  %s271_s12 = smov [#allocation3]  }
   0x3   :  { %s16_s13 = sshll.u32 %s271_s12, 4  ;;  %s17_s13 = int_to_ptr.vmem [resolvable:$true] %s16_s13 }
   0x4   :  { %s213_s14 = scalar_lea.vmem %s17_s13, 256  ;;  %p218_p1 = scmp.lt.s32.totalorder %s17_s13, %s17_s13 }
   0x5   :  { %p214_p0 = scmp.ne.s32.totalorder %s17_s13, %s213_s14  ;;  %p219_p2 = scmp.lt.s32.totalorder %s213_s14, %s213_s14 }
   0x7   :  { %p220_p3 = por %p219_p2, %p218_p1 }
   0x9   :  { %p221_p4 = pnand %p220_p3, %p214_p0 }
   0xb   :  { %224 = shalt.err (!%p221_p4)
}
   0xc   :  { %s272_s15 = smov 128   ;;  %s273_s16 = smov 8  }
   0xd   :  { %22 = dma.hbm_to_vmem [thread:$0]  %s326_s0, 256, %s17_s13, [#allocation4], %s272_s15, %s272_s15, %s273_s16  }
   0xe   :  { %s274_s19 = smov [#allocation6]  }
   0xf   :  { %s28_s20 = sshll.u32 %s274_s19, 4  ;;  %s29_s20 = int_to_ptr.vmem [resolvable:$true] %s28_s20 }
  0x10   :  { %s233_s21 = scalar_lea.vmem %s29_s20, 512  ;;  %p238_p6 = scmp.lt.s32.totalorder %s29_s20, %s29_s20 }
  0x11   :  { %p234_p5 = scmp.ne.s32.totalorder %s29_s20, %s233_s21  ;;  %p239_p7 = scmp.lt.s32.totalorder %s233_s21, %s233_s21 }
  0x13   :  { %p240_p8 = por %p239_p7, %p238_p6 }
  0x15   :  { %p241_p9 = pnand %p240_p8, %p234_p5 }
  0x17   :  { %244 = shalt.err (!%p241_p9)
}
  0x18   :  { %34 = dma.hbm_to_vmem [thread:$0]  %s327_s1, 512, %s29_s20, [#allocation7], %s272_s15, %s272_s15, %s273_s16  }
  0x19   :  { %265 = dma.done.wait [#allocation4], 256  }
  0x1a   :  { %266 = vsyncadd [#allocation4], 4294967040 }
  0x1b   :  { %267 = dma.done.wait [#allocation7], 512  }
  0x1c   :  { %268 = vsyncadd [#allocation7], 4294966784  ;;  %vm47_vm0 = vcmask 785408   ;;  %v275_v0 = vmov 0.0   ;;  %vm58_vm1 = vcmask 261120   ;;  %v57_v1 = vld [vmem:[#allocation6 + $0x18] sm:$0xff] }
  0x1d   :  { %49 = vst.msk [vmem:[#allocation2 + $0x8] sm:$0xff] %vm47_vm0, %v275_v0  ;;  %48 = vst.msk [vmem:[#allocation2] sm:$0xff] %vm47_vm0, %v275_v0  ;;  %v56_v2 = vld [vmem:[#allocation6 + $0x10] sm:$0xff]  ;;  %188 = vmatprep.subr.mxu0 %v57_v1  ;;  %v55_v4 = vld [vmem:[#allocation6 + $0x8] sm:$0xff]  ;;  %s276_s24 = smov [#allocation8]  }
  0x1e   :  { %v52_v3 = vld [vmem:[#allocation3] sm:$0xff]  ;;  %189 = vmatpush3.msra.mxu0 %v57_v1  ;;  %v54_v5 = vld [vmem:[#allocation6] sm:$0xff]  ;;  %v53_v6 = vld [vmem:[#allocation3 + $0x8] sm:$0xff]  ;;  %s166_s25 = sshll.u32 %s276_s24, 4  ;;  %s167_s25 = int_to_ptr.vmem [resolvable:$true] %s166_s25 }
  0x1f   :  { %196 = vmatprep.mubr.msk.f32.mxu0 %vm58_vm1, %v52_v3  ;;  %190 = vmatprep.subr.mxu0 %v56_v2  ;;  %v181_v13 = vld [vmem:[%s328_s2] ss:$0 sm:$0xff]  ;;  %s245_s26 = scalar_lea.vmem %s167_s25, 256  ;;  %p250_p11 = scmp.lt.s32.totalorder %s167_s25, %s167_s25 }
  0x20   :  { %191 = vmatpush3.msra.mxu0 %v56_v2  ;;  %p246_p10 = scmp.ne.s32.totalorder %s167_s25, %s245_s26  ;;  %p251_p12 = scmp.lt.s32.totalorder %s245_s26, %s245_s26 }
  0x21   :  { %192 = vmatprep.subr.mxu0 %v55_v4 }
  0x22   :  { %193 = vmatpush3.msra.mxu0 %v55_v4  ;;  %p252_p13 = por %p251_p12, %p250_p11 }
  0x23   :  { %194 = vmatprep.subr.mxu0 %v54_v5 }
  0x24   :  { %195 = vmatpush3.msra.mxu0 %v54_v5  ;;  %v51_v7 = vld [vmem:[#allocation2 + $0x8] sm:$0xff]  ;;  %v50_v9 = vld [vmem:[#allocation2] sm:$0xff]  ;;  %p253_p0 = pnand %p252_p13, %p246_p10 }
  0x25   :  { %197 = vmatmul.mubr.msk.f32.vlgmr.msra.gmra.mxu0 %vm58_vm1, %v53_v6 }
  0xe5   :  { %v198_v8 = vpop.f32.mrf.mxu0 }
  0xe6   :  { %v141_v10 = vadd.f32 %v198_v8, %v51_v7 }
  0xe7   :  { %v131_v11 = vpop.f32.mrf.mxu0 }
  0xe8   :  { %144 = vst.msk [vmem:[#allocation2 + $0x8] sm:$0xff] %vm47_vm0, %v141_v10  ;;  %v140_v12 = vadd.f32 %v131_v11, %v50_v9 }
  0xea   :  { %143 = vst.msk [vmem:[#allocation2] sm:$0xff] %vm47_vm0, %v140_v12 }
  0xef   :  { %v149_v14 = vld [vmem:[#allocation2 + $0x8] sm:$0xff] }
  0xf0   :  { %v158_v15 = vadd.f32 %v181_v13, %v149_v14 }
  0xf1   :  { %v148_v16 = vld [vmem:[#allocation2] sm:$0xff] }
  0xf2   :  { %v157_v17 = vadd.f32 %v181_v13, %v148_v16  ;;  %160 = vst.msk [vmem:[#allocation8 + $0x8] sm:$0xff] %vm47_vm0, %v158_v15 }
  0xf4   :  { %159 = vst.msk [vmem:[#allocation8] sm:$0xff] %vm47_vm0, %v157_v17 }
  0xf5   :  { %256 = shalt.err (!%p253_p0)
}
  0xf6   :  { %172 = dma.vmem_to_hbm [thread:$0]  %s167_s25, 256, %s329_s3, [#allocation5], %s272_s15, %s272_s15, %s273_s16  }
  0xf7   :  { %269 = dma.done.wait [#allocation5], 256  }
  0xf8   :  { %270 = vsyncadd [#allocation5], 4294967040 }
  0xf9   :  { %176 = vsyncpa [#allocation4], 1 }
  0xfa   :  { %177 = vsyncpa [#allocation7], 1 }
  0xfb   :  { %178 = vsyncpa [#allocation5], 1 }

</bundles_post_ra>
